<compile_context>
chip_gen: v7x
topology: tpu7x:2x2x1
jax: 0.10.0
libtpu: 0.0.40
codegen_flags: <defaults>
</compile_context>

<pallas_src>
import numpy as np
import jax
import jax.numpy as jnp
from jax import lax
from jax.experimental import pallas as pl
from jax.experimental.pallas import tpu as pltpu


def _round_up(x, m):
    return ((x + m - 1) // m) * m


def _pick_tile(n, target):
    """Largest divisor of n that is <= target and a multiple of 8 (else n)."""
    if n <= target:
        return n
    if n % target == 0:
        return target
    for d in range(target, 7, -1):
        if n % d == 0 and d % 8 == 0:
            return d
    return n


# ----------------------------------------------------------------------------
# Kernel 1: fused 1x1-conv Q/K/V projection, row-tiled over N = H*W.
# ----------------------------------------------------------------------------
def _qkv_kernel(x_ref, wq_ref, bq_ref, wk_ref, bk_ref, wv_ref, bv_ref,
                q_ref, k_ref, v_ref):
    xb = x_ref[0].astype(jnp.bfloat16)                       # (TN, C) bf16 MXU input
    q = jnp.dot(xb, wq_ref[...], preferred_element_type=jnp.float32) + bq_ref[...]
    k = jnp.dot(xb, wk_ref[...], preferred_element_type=jnp.float32) + bk_ref[...]
    v = jnp.dot(xb, wv_ref[...], preferred_element_type=jnp.float32) + bv_ref[...]
    q_ref[0] = q.astype(q_ref.dtype)
    k_ref[0] = k.astype(k_ref.dtype)
    v_ref[0] = v.astype(v_ref.dtype)


def _qkv_project(xf, wq_p, bq_p, wk_p, bk_p, wv_b, bv_p, tn):
    B, N, C = xf.shape
    CQP = wq_p.shape[-1]
    rep = lambda b, i: (0, 0)   # weights: block index constant -> stay resident
    return pl.pallas_call(
        _qkv_kernel,
        out_shape=(jax.ShapeDtypeStruct((B, N, CQP), jnp.bfloat16),
                   jax.ShapeDtypeStruct((B, N, CQP), jnp.bfloat16),
                   jax.ShapeDtypeStruct((B, N, C), jnp.bfloat16)),
        grid_spec=pltpu.PrefetchScalarGridSpec(
            num_scalar_prefetch=0,
            grid=(B, N // tn),
            in_specs=[
                pl.BlockSpec((1, tn, C), lambda b, i: (b, i, 0)),
                pl.BlockSpec((C, CQP), rep),
                pl.BlockSpec((1, CQP), rep),
                pl.BlockSpec((C, CQP), rep),
                pl.BlockSpec((1, CQP), rep),
                pl.BlockSpec((C, C), rep),
                pl.BlockSpec((1, C), rep),
            ],
            out_specs=[
                pl.BlockSpec((1, tn, CQP), lambda b, i: (b, i, 0)),
                pl.BlockSpec((1, tn, CQP), lambda b, i: (b, i, 0)),
                pl.BlockSpec((1, tn, C), lambda b, i: (b, i, 0)),
            ]),
        compiler_params=pltpu.CompilerParams(
            dimension_semantics=("parallel", "parallel")),
    )(xf, wq_p, bq_p, wk_p, bk_p, wv_b, bv_p)


# ----------------------------------------------------------------------------
# Kernel 2: flash-style position attention with fused gamma*out + x residual.
#   out_n = sum_m softmax_m(q_n . k_m) * v_m ;  y = gamma * out + x
# ----------------------------------------------------------------------------
def _flash_pam_kernel(q_ref, k_ref, v_ref, x_ref, g_ref, o_ref,
                      m_sc, l_sc, acc_sc):
    kv = pl.program_id(2)

    @pl.when(kv == 0)
    def _():
        m_sc[...] = jnp.full_like(m_sc, -jnp.inf)
        l_sc[...] = jnp.zeros_like(l_sc)
        acc_sc[...] = jnp.zeros_like(acc_sc)

    q = q_ref[0]                                             # (TQ, CQP) bf16
    k = k_ref[0]                                             # (TK, CQP) bf16
    s = lax.dot_general(q, k, (((1,), (1,)), ((), ())),
                        preferred_element_type=jnp.float32)  # (TQ, TK) f32

    m_prev = m_sc[...]
    m_new = jnp.maximum(m_prev, jnp.max(s, axis=-1, keepdims=True))
    alpha = jnp.exp(m_prev - m_new)
    p = jnp.exp(s - m_new)
    l_sc[...] = alpha * l_sc[...] + jnp.sum(p, axis=-1, keepdims=True)
    acc_sc[...] = alpha * acc_sc[...] + jnp.dot(
        p.astype(v_ref.dtype), v_ref[0], preferred_element_type=jnp.float32)
    m_sc[...] = m_new

    @pl.when(kv == pl.num_programs(2) - 1)
    def _():
        inv_l = pl.reciprocal(l_sc[...], approx=True)        # EUP slot
        attn_out = acc_sc[...] * inv_l                       # (TQ, C) f32
        o_ref[0] = (attn_out * g_ref[...] + x_ref[0]).astype(o_ref.dtype)


def _flash_pam(q, k, v, xf, gamma, tq, tk):
    B, N, CQP = q.shape
    C = xf.shape[-1]
    return pl.pallas_call(
        _flash_pam_kernel,
        out_shape=jax.ShapeDtypeStruct((B, N, C), xf.dtype),
        grid_spec=pltpu.PrefetchScalarGridSpec(
            num_scalar_prefetch=0,
            grid=(B, N // tq, N // tk),
            in_specs=[
                pl.BlockSpec((1, tq, CQP), lambda b, i, j: (b, i, 0)),
                pl.BlockSpec((1, tk, CQP), lambda b, i, j: (b, j, 0)),
                pl.BlockSpec((1, tk, C), lambda b, i, j: (b, j, 0)),
                pl.BlockSpec((1, tq, C), lambda b, i, j: (b, i, 0)),
                pl.BlockSpec((1, 1), lambda b, i, j: (0, 0)),
            ],
            out_specs=pl.BlockSpec((1, tq, C), lambda b, i, j: (b, i, 0)),
            scratch_shapes=[
                pltpu.VMEM((tq, 1), jnp.float32),    # running max m
                pltpu.VMEM((tq, 1), jnp.float32),    # running denom l
                pltpu.VMEM((tq, C), jnp.float32),    # output accumulator
            ]),
        compiler_params=pltpu.CompilerParams(
            dimension_semantics=("parallel", "parallel", "arbitrary")),
    )(q, k, v, xf, gamma)


# ----------------------------------------------------------------------------
# Wrapper: PAM_Module.forward  (x: NCHW, like PyTorch)
# ----------------------------------------------------------------------------
def pam_module(x_nchw, wq, bq, wk, bk, wv, bv, gamma,
               *, row_tile=128, q_tile=128, kv_tile=128):
    B, C, H, W = x_nchw.shape
    N = H * W
    cq = wq.shape[-1]
    CQP = _round_up(max(cq, 128), 128)   # lane-dense padded q/k head dim

    # NCHW -> (B, N, C), n = h*W + w (matches torch .view(B, -1, H*W))
    xf = jnp.transpose(x_nchw, (0, 2, 3, 1)).reshape(B, N, C)

    TN = _pick_tile(N, row_tile)
    TQ = _pick_tile(N, q_tile)
    TK = _pick_tile(N, kv_tile)

    # Pre-cast weights to bf16 once; zero-pad q/k projections to CQP lanes
    # (padded lanes are zero in both q and k, so they add nothing to energy).
    bf = jnp.bfloat16
    wq_p = jnp.zeros((C, CQP), bf).at[:, :cq].set(wq.astype(bf))
    wk_p = jnp.zeros((C, CQP), bf).at[:, :cq].set(wk.astype(bf))
    bq_p = jnp.zeros((1, CQP), jnp.float32).at[:, :cq].set(
        jnp.asarray(bq, jnp.float32).reshape(1, cq))
    bk_p = jnp.zeros((1, CQP), jnp.float32).at[:, :cq].set(
        jnp.asarray(bk, jnp.float32).reshape(1, cq))
    wv_b = wv.astype(bf)
    bv_p = jnp.asarray(bv, jnp.float32).reshape(1, C)
    g = jnp.asarray(gamma, jnp.float32).reshape(1, 1)

    q, k, v = _qkv_project(xf, wq_p, bq_p, wk_p, bk_p, wv_b, bv_p, TN)
    y = _flash_pam(q, k, v, xf, g, TQ, TK)            # (B, N, C) f32

    return jnp.transpose(y.reshape(B, H, W, C), (0, 3, 1, 2))   # back to NCHW


# ----------------------------------------------------------------------------
# Pure-JAX f32 reference (PyTorch semantics) for correctness check
# ----------------------------------------------------------------------------
def pam_ref(x_nchw, wq, bq, wk, bk, wv, bv, gamma):
    hp = lax.Precision.HIGHEST
    B, C, H, W = x_nchw.shape
    N = H * W
    xf = jnp.transpose(x_nchw.reshape(B, C, N), (0, 2, 1))   # (B, N, C)
    q = jnp.einsum('bnc,cd->bnd', xf, wq, precision=hp) + bq
    k = jnp.einsum('bnc,cd->bnd', xf, wk, precision=hp) + bk
    v = jnp.einsum('bnc,cd->bnd', xf, wv, precision=hp) + bv
    energy = jnp.einsum('bnd,bmd->bnm', q, k, precision=hp)
    attn = jax.nn.softmax(energy, axis=-1)
    out = jnp.einsum('bnm,bmc->bnc', attn, v, precision=hp)
    y = gamma * out + xf
    return jnp.transpose(y, (0, 2, 1)).reshape(B, C, H, W)


if __name__ == "__main__":
    key = jax.random.PRNGKey(0)
    B, C, H, W = 2, 64, 16, 16            # in_dim=64 -> query/key dim = 8
    keys = jax.random.split(key, 8)
    x = jax.random.normal(keys[0], (B, C, H, W), jnp.float32)   # PyTorch NCHW

    cq = C // 8
    # Conv2d 1x1 weights expressed as (Cin, Cout) matrices.
    wq = jax.random.normal(keys[1], (C, cq), jnp.float32) / np.sqrt(C)
    bq = 0.05 * jax.random.normal(keys[2], (cq,), jnp.float32)
    wk = jax.random.normal(keys[3], (C, cq), jnp.float32) / np.sqrt(C)
    bk = 0.05 * jax.random.normal(keys[4], (cq,), jnp.float32)
    wv = jax.random.normal(keys[5], (C, C), jnp.float32) / np.sqrt(C)
    bv = 0.05 * jax.random.normal(keys[6], (C,), jnp.float32)
    gamma = 1.0                            # Parameter(torch.ones(1))

    out = pam_module(x, wq, bq, wk, bk, wv, bv, gamma)
    out = jax.block_until_ready(out)

    ref = pam_ref(x, wq, bq, wk, bk, wv, bv, gamma)
    # Tolerance accounts for bf16 MXU inputs (accumulation / softmax stats f32).
    np.testing.assert_allclose(np.asarray(out), np.asarray(ref),
                               rtol=2e-2, atol=5e-2)
    print("KERNEL_OK")
</pallas_src>

<mosaic_0001>
module attributes {stable_mosaic.version = 11 : i64} {
  func.func @_qkv_kernel(%arg0: i32, %arg1: i32, %arg2: memref<1x128x64xf32, #tpu.memory_space<vmem>>, %arg3: memref<64x128xbf16, #tpu.memory_space<vmem>>, %arg4: memref<1x128xf32, #tpu.memory_space<vmem>>, %arg5: memref<64x128xbf16, #tpu.memory_space<vmem>>, %arg6: memref<1x128xf32, #tpu.memory_space<vmem>>, %arg7: memref<64x64xbf16, #tpu.memory_space<vmem>>, %arg8: memref<1x64xf32, #tpu.memory_space<vmem>>, %arg9: memref<1x128x128xbf16, #tpu.memory_space<vmem>>, %arg10: memref<1x128x128xbf16, #tpu.memory_space<vmem>>, %arg11: memref<1x128x64xbf16, #tpu.memory_space<vmem>>) attributes {dimension_semantics = [#tpu.dimension_semantics<parallel>, #tpu.dimension_semantics<parallel>], iteration_bounds = array<i64: 2, 2>, scalar_prefetch = 0 : i64, scratch_operands = 0 : i64, tpu.core_type = #tpu.core_type<tc>, window_params = [{transform_indices = @transform_0, window_bounds = array<i64: 1, 128, 64>}, {pipeline_mode = #tpu.pipeline_mode<synchronous>, transform_indices = @transform_1, window_bounds = array<i64: 64, 128>}, {pipeline_mode = #tpu.pipeline_mode<synchronous>, transform_indices = @transform_2, window_bounds = array<i64: 1, 128>}, {pipeline_mode = #tpu.pipeline_mode<synchronous>, transform_indices = @transform_3, window_bounds = array<i64: 64, 128>}, {pipeline_mode = #tpu.pipeline_mode<synchronous>, transform_indices = @transform_4, window_bounds = array<i64: 1, 128>}, {pipeline_mode = #tpu.pipeline_mode<synchronous>, transform_indices = @transform_5, window_bounds = array<i64: 64, 64>}, {pipeline_mode = #tpu.pipeline_mode<synchronous>, transform_indices = @transform_6, window_bounds = array<i64: 1, 64>}, {transform_indices = @transform_7, window_bounds = array<i64: 1, 128, 128>}, {transform_indices = @transform_8, window_bounds = array<i64: 1, 128, 128>}, {transform_indices = @transform_9, window_bounds = array<i64: 1, 128, 64>}]} {
    %c0 = arith.constant 0 : index
    %c0_0 = arith.constant 0 : index
    %c0_1 = arith.constant 0 : index
    %0 = vector.load %arg2[%c0, %c0_0, %c0_1] : memref<1x128x64xf32, #tpu.memory_space<vmem>>, vector<1x128x64xf32>
    %1 = vector.shape_cast %0 : vector<1x128x64xf32> to vector<128x64xf32>
    %2 = arith.truncf %1 : vector<128x64xf32> to vector<128x64xbf16>
    %c0_2 = arith.constant 0 : index
    %c0_3 = arith.constant 0 : index
    %3 = vector.load %arg3[%c0_2, %c0_3] : memref<64x128xbf16, #tpu.memory_space<vmem>>, vector<64x128xbf16>
    %cst = arith.constant dense<0.000000e+00> : vector<128x128xf32>
    %4 = tpu.matmul %2, %3, %cst {dimension_numbers = #tpu.dot_dimension_numbers<[1], [0], [0], [1], [0, 0, 1, 1], [], []>} : vector<128x64xbf16>, vector<64x128xbf16>, vector<128x128xf32> -> vector<128x128xf32>
    %c0_4 = arith.constant 0 : index
    %c0_5 = arith.constant 0 : index
    %5 = vector.load %arg4[%c0_4, %c0_5] : memref<1x128xf32, #tpu.memory_space<vmem>>, vector<1x128xf32>
    %6 = vector.broadcast %5 : vector<1x128xf32> to vector<128x128xf32>
    %7 = arith.addf %4, %6 : vector<128x128xf32>
    %c0_6 = arith.constant 0 : index
    %c0_7 = arith.constant 0 : index
    %8 = vector.load %arg5[%c0_6, %c0_7] : memref<64x128xbf16, #tpu.memory_space<vmem>>, vector<64x128xbf16>
    %cst_8 = arith.constant dense<0.000000e+00> : vector<128x128xf32>
    %9 = tpu.matmul %2, %8, %cst_8 {dimension_numbers = #tpu.dot_dimension_numbers<[1], [0], [0], [1], [0, 0, 1, 1], [], []>} : vector<128x64xbf16>, vector<64x128xbf16>, vector<128x128xf32> -> vector<128x128xf32>
    %c0_9 = arith.constant 0 : index
    %c0_10 = arith.constant 0 : index
    %10 = vector.load %arg6[%c0_9, %c0_10] : memref<1x128xf32, #tpu.memory_space<vmem>>, vector<1x128xf32>
    %11 = vector.broadcast %10 : vector<1x128xf32> to vector<128x128xf32>
    %12 = arith.addf %9, %11 : vector<128x128xf32>
    %c0_11 = arith.constant 0 : index
    %c0_12 = arith.constant 0 : index
    %13 = vector.load %arg7[%c0_11, %c0_12] : memref<64x64xbf16, #tpu.memory_space<vmem>>, vector<64x64xbf16>
    %cst_13 = arith.constant dense<0.000000e+00> : vector<128x64xf32>
    %14 = tpu.matmul %2, %13, %cst_13 {dimension_numbers = #tpu.dot_dimension_numbers<[1], [0], [0], [1], [0, 0, 1, 1], [], []>} : vector<128x64xbf16>, vector<64x64xbf16>, vector<128x64xf32> -> vector<128x64xf32>
    %c0_14 = arith.constant 0 : index
    %c0_15 = arith.constant 0 : index
    %15 = vector.load %arg8[%c0_14, %c0_15] : memref<1x64xf32, #tpu.memory_space<vmem>>, vector<1x64xf32>
    %16 = vector.broadcast %15 : vector<1x64xf32> to vector<128x64xf32>
    %17 = arith.addf %14, %16 : vector<128x64xf32>
    %18 = arith.truncf %7 : vector<128x128xf32> to vector<128x128xbf16>
    %c0_16 = arith.constant 0 : index
    %c0_17 = arith.constant 0 : index
    %c0_18 = arith.constant 0 : index
    %19 = vector.load %arg9[%c0_16, %c0_17, %c0_18] : memref<1x128x128xbf16, #tpu.memory_space<vmem>>, vector<1x128x128xbf16>
    %20 = vector.shape_cast %19 : vector<1x128x128xbf16> to vector<128x128xbf16>
    %21 = vector.shape_cast %18 : vector<128x128xbf16> to vector<1x128x128xbf16>
    tpu.vector_store %arg9[%c0_16, %c0_17, %c0_18], %21 {strides = array<i32>} : memref<1x128x128xbf16, #tpu.memory_space<vmem>>, vector<1x128x128xbf16>,
    %22 = arith.truncf %12 : vector<128x128xf32> to vector<128x128xbf16>
    %c0_19 = arith.constant 0 : index
    %c0_20 = arith.constant 0 : index
    %c0_21 = arith.constant 0 : index
    %23 = vector.load %arg10[%c0_19, %c0_20, %c0_21] : memref<1x128x128xbf16, #tpu.memory_space<vmem>>, vector<1x128x128xbf16>
    %24 = vector.shape_cast %23 : vector<1x128x128xbf16> to vector<128x128xbf16>
    %25 = vector.shape_cast %22 : vector<128x128xbf16> to vector<1x128x128xbf16>
    tpu.vector_store %arg10[%c0_19, %c0_20, %c0_21], %25 {strides = array<i32>} : memref<1x128x128xbf16, #tpu.memory_space<vmem>>, vector<1x128x128xbf16>,
    %26 = arith.truncf %17 : vector<128x64xf32> to vector<128x64xbf16>
    %c0_22 = arith.constant 0 : index
    %c0_23 = arith.constant 0 : index
    %c0_24 = arith.constant 0 : index
    %27 = vector.load %arg11[%c0_22, %c0_23, %c0_24] : memref<1x128x64xbf16, #tpu.memory_space<vmem>>, vector<1x128x64xbf16>
    %28 = vector.shape_cast %27 : vector<1x128x64xbf16> to vector<128x64xbf16>
    %29 = vector.shape_cast %26 : vector<128x64xbf16> to vector<1x128x64xbf16>
    tpu.vector_store %arg11[%c0_22, %c0_23, %c0_24], %29 {strides = array<i32>} : memref<1x128x64xbf16, #tpu.memory_space<vmem>>, vector<1x128x64xbf16>,
    return
  }
  func.func @transform_0(%arg0: i32, %arg1: i32) -> (i32, i32, i32) {
    %c0_i32 = arith.constant 0 : i32
    %c0_i32_0 = arith.constant 0 : i32
    return %arg0, %arg1, %c0_i32 : i32, i32, i32
  }
  func.func @transform_1(%arg0: i32, %arg1: i32) -> (i32, i32) {
    %c0_i32 = arith.constant 0 : i32
    %c0_i32_0 = arith.constant 0 : i32
    %c0_i32_1 = arith.constant 0 : i32
    return %c0_i32, %c0_i32_0 : i32, i32
  }
  func.func @transform_2(%arg0: i32, %arg1: i32) -> (i32, i32) {
    %c0_i32 = arith.constant 0 : i32
    %c0_i32_0 = arith.constant 0 : i32
    %c0_i32_1 = arith.constant 0 : i32
    return %c0_i32, %c0_i32_0 : i32, i32
  }
  func.func @transform_3(%arg0: i32, %arg1: i32) -> (i32, i32) {
    %c0_i32 = arith.constant 0 : i32
    %c0_i32_0 = arith.constant 0 : i32
    %c0_i32_1 = arith.constant 0 : i32
    return %c0_i32, %c0_i32_0 : i32, i32
  }
  func.func @transform_4(%arg0: i32, %arg1: i32) -> (i32, i32) {
    %c0_i32 = arith.constant 0 : i32
    %c0_i32_0 = arith.constant 0 : i32
    %c0_i32_1 = arith.constant 0 : i32
    return %c0_i32, %c0_i32_0 : i32, i32
  }
  func.func @transform_5(%arg0: i32, %arg1: i32) -> (i32, i32) {
    %c0_i32 = arith.constant 0 : i32
    %c0_i32_0 = arith.constant 0 : i32
    %c0_i32_1 = arith.constant 0 : i32
    return %c0_i32, %c0_i32_0 : i32, i32
  }
  func.func @transform_6(%arg0: i32, %arg1: i32) -> (i32, i32) {
    %c0_i32 = arith.constant 0 : i32
    %c0_i32_0 = arith.constant 0 : i32
    %c0_i32_1 = arith.constant 0 : i32
    return %c0_i32, %c0_i32_0 : i32, i32
  }
  func.func @transform_7(%arg0: i32, %arg1: i32) -> (i32, i32, i32) {
    %c0_i32 = arith.constant 0 : i32
    %c0_i32_0 = arith.constant 0 : i32
    return %arg0, %arg1, %c0_i32 : i32, i32, i32
  }
  func.func @transform_8(%arg0: i32, %arg1: i32) -> (i32, i32, i32) {
    %c0_i32 = arith.constant 0 : i32
    %c0_i32_0 = arith.constant 0 : i32
    return %arg0, %arg1, %c0_i32 : i32, i32, i32
  }
  func.func @transform_9(%arg0: i32, %arg1: i32) -> (i32, i32, i32) {
    %c0_i32 = arith.constant 0 : i32
    %c0_i32_0 = arith.constant 0 : i32
    return %arg0, %arg1, %c0_i32 : i32, i32, i32
  }
}

</mosaic_0001>

<bundles_post_ra>
// kernel: tpu_custom_call.1
= control target key start
LH: loop header
LB: loop body
LE: loop exit
PB: predicated region body
PF: predicated region fallthrough
CT: control target
= control target key end

     0   :  { %15 = vsyncpa [#allocation3], 0  ;;  %s2331_s0 = inlined_call_operand.vmem [shape: f32[2,256,64], index: 0, kind: input, shape index: {}]   ;;  %s2332_s1 = inlined_call_operand.vmem [shape: bf16[64,128], index: 1, kind: input, shape index: {}]   ;;  %s2333_s2 = inlined_call_operand.vmem [shape: f32[1,128], index: 2, kind: input, shape index: {}]   ;;  %s2334_s3 = inlined_call_operand.vmem [shape: bf16[64,128], index: 3, kind: input, shape index: {}]   ;;  %s2335_s4 = inlined_call_operand.vmem [shape: f32[1,128], index: 4, kind: input, shape index: {}]   ;;  %s2336_s5 = inlined_call_operand.vmem [shape: bf16[64,64], index: 5, kind: input, shape index: {}]   ;;  %s2337_s6 = inlined_call_operand.vmem [shape: f32[1,64], index: 6, kind: input, shape index: {}]   ;;  %s2338_s7 = inlined_call_operand.hbm [shape: bf16[2,256,128], index: 7, kind: output, shape index: {0}]   ;;  %s2339_s8 = inlined_call_operand.hbm [shape: bf16[2,256,128], index: 8, kind: output, shape index: {1}]   ;;  %s2340_s9 = inlined_call_operand.vmem [shape: bf16[2,256,64], index: 9, kind: output, shape index: {2}]  }
   0x1   :  { %17 = vsyncpa [#allocation3 + $0x1], 0 }
   0x2   :  { %18 = vsyncpa [#allocation5], 0 }
   0x3   :  { %20 = vsyncpa [#allocation5 + $0x1], 0  ;;  %s1944_s30 = smov 0   ;;  %s1946_s10 = smov 0  }
   0x4   :  { %s1948_s11 = smov 0   ;;  %s1950_s12 = smov 0  }
   0x5   :  { %s1952_s13 = smov 0   ;;  %s1954_s14 = smov 0  }
   0x6   :  { %s1956_s15 = smov 0   ;;  %s1958_s16 = smov 0  }
   0x7 LB: > { %2347 = sst [smem:[#allocation8_spill]] %s1880_s14  ;;  %s1304_s17 = sadd.s32 4294967295, %s1888_s16   ;;  %s1888_s16 = sphi %s1958_s16, %s26_s16   ;;  %s1884_s15 = sphi %s1956_s15, %s2359_s15   ;;  %s1880_s14 = sphi %s1954_s14, %s2358_s14   ;;  %s1876_s13 = sphi %s1952_s13, %s2357_s13   ;;  %s1872_s12 = sphi %s1950_s12, %s2356_s12   ;;  %s1868_s11 = sphi %s1948_s11, %s2362_s11   ;;  %s1864_s10 = sphi %s1946_s10, %s2361_s10   ;;  %s1860_s30 = sphi %s1944_s30, %s2360_s30  }
   0x8   : > { %2348 = sst [smem:[#allocation9_spill]] %s1884_s15  ;;  %s1305_s18 = sadd.s32 4294967294, %s1888_s16  }
   0x9   : > { %s35_s19 = sadd.s32 1, %s1880_s14  ;;  %s38_s20 = sadd.s32 1, %s1884_s15 }
   0xa   : > { %p36_p0 = scmp.ge.s32.totalorder %s35_s19, 2  ;;  %p211_p1 = scmp.ne.s32.totalorder %s1868_s11, %s1864_s10 }
   0xb   : > { %p212_p2 = scmp.eq.s32.totalorder %s1304_s17, 3  ;;  %p217_p5 = scmp.ne.s32.totalorder %s1864_s10, %s1860_s30 }
   0xc   : > { %s2364_s19 = smov (%p36_p0, %s35_s19), 0  ;;  %s2366_s20 = smov (!%p36_p0, %s38_s20), %s1884_s15 }
   0xd   : > { %2349 = sst [smem:[#allocation10_spill]] %s2364_s19  ;;  %s197_s21 = ssub.s32 %s1880_s14, %s2364_s19 }
   0xe   : > { %p1995_p3 = por %p212_p2, %p211_p1  ;;  %p40_p4 = scmp.ge.s32.totalorder %s2366_s20, 2 }
   0xf   : > { %p218_p6 = scmp.eq.s32.totalorder %s1305_s18, 3  ;;  %p1308_p7 = scmp.ge.s32.totalorder %s1888_s16, 1 }
  0x10   : > { %s2368_s20 = smov (%p40_p4, %s2366_s20), 0  ;;  %p323_p9 = scmp.lt.s32.totalorder %s1888_s16, 5 }
  0x11   : > { %2351 = sst [smem:[#allocation11_spill]] %s2368_s20  ;;  %p2004_p8 = por %p218_p6, %p217_p5 }
  0x12   : > { %s196_s24 = ssub.s32 %s1884_s15, %s2368_s20  ;;  %s201_s25 = sadd.s32 1, %s1868_s11 }
  0x13   : > { %s198_s26 = sor.u32 %s197_s21, %s196_s24  ;;  %p324_p10 = pnand %p1308_p7, %p323_p9 }
  0x14   : > { %p199_p11 = scmp.eq.s32.totalorder %s198_s26, 0  ;;  %v1750_v0 = vld [vmem:[%s2332_s1] sm:$0xff] (!%p324_p10)   ;;  %s2019_s17 = sshll.u32 (!%p324_p10), %s1872_s12, 4  ;;  %v1751_v1 = vld [vmem:[%s2332_s1 + $0x8] sm:$0xff] (!%p324_p10)   ;;  %v1752_v2 = vld [vmem:[%s2332_s1 + $0x10] sm:$0xff] (!%p324_p10)   ;;  %vm463_vm0 = vcmask (!%p324_p10), 523264  }
  0x15   : > { %327 = sbr.rel (%p324_p10) target bundleno = 318 (0x13e), region = 48  ;;  %p378_p12 = scmp.lt.s32.totalorder (!%p324_p10), %s1876_s13, 1  ;;  %1592 = vmatprep.subr.bf16.mxu0 (!%p324_p10), %v1750_v0  ;;  %1664 = vmatprep.subr.bf16.mxu1 (!%p324_p10), %v1750_v0  ;;  %v1753_v3 = vld [vmem:[%s2332_s1 + $0x18] sm:$0xff] (!%p324_p10)   ;;  %v1754_v14 = vld [vmem:[%s2334_s3] sm:$0xff] (!%p324_p10)   ;;  %v1756_v22 = vld [vmem:[%s2334_s3 + $0x8] sm:$0xff] (!%p324_p10)  }
  0x16   : > { %s2013_s27 = scalar_select %p199_p11, %s1868_s11, %s201_s25  }
  0x17   : > { %p380_p13 = scmp.lt.s32.totalorder (!%p324_p10), %s2019_s17, 31  ;;  %1593 = vmatpush3.bf16.msra.mxu0 (!%p324_p10), %v1750_v0  ;;  %1668 = vmatpush3.bf16.msra.mxu1 (!%p324_p10), %v1750_v0  ;;  %v1755_v15 = vld [vmem:[%s2336_s5] sm:$0xff] (!%p324_p10)   ;;  %v1757_v23 = vld [vmem:[%s2336_s5 + $0x8] sm:$0xff] (!%p324_p10)   ;;  %v1758_v30 = vld [vmem:[%s2334_s3 + $0x10] sm:$0xff] (!%p324_p10)   ;;  %s1407_s18 = sshll.u32 (!%p324_p10), %s1876_s13, 5 }
  0x18   : > { %1594 = vmatprep.subr.bf16.mxu0 (!%p324_p10), %v1751_v1  ;;  %1665 = vmatprep.subr.bf16.mxu1 (!%p324_p10), %v1751_v1  ;;  %v1759_v31 = vld [vmem:[%s2336_s5 + $0x10] sm:$0xff] (!%p324_p10)   ;;  %v1760_v34 = vld [vmem:[%s2334_s3 + $0x18] sm:$0xff] (!%p324_p10)   ;;  %v1317_v36 = vld [vmem:[%s2333_s2] ss:$0 sm:$0xff] (!%p324_p10)  ;;  %s2126_s20 = sadd.s32 (!%p324_p10), %s1407_s18, %s2019_s17 }
  0x19   : > { %v1761_v35 = vld [vmem:[%s2336_s5 + $0x18] sm:$0xff] (!%p324_p10)  }
  0x1b   : > { %1595 = vmatpush3.bf16.msra.mxu0 (!%p324_p10), %v1751_v1  ;;  %1669 = vmatpush3.bf16.msra.mxu1 (!%p324_p10), %v1751_v1 }
  0x1c   : > { %s379_s21 = scalar_select %p378_p12, %s1876_s13, 1  ;;  %1596 = vmatprep.subr.bf16.mxu0 %v1752_v2  ;;  %1666 = vmatprep.subr.bf16.mxu1 %v1752_v2 }
  0x1d   : > { %s381_s12 = scalar_select %p380_p13, %s2019_s17, 31 }
  0x1e   : > { %s1312_s26 = sshll.u32 %s379_s21, 5  ;;  %s2345_s13 = sshll.u32 %s2126_s20, 6 }
  0x1f   : > { %s2031_s28 = sadd.s32 %s1312_s26, %s381_s12  ;;  %1597 = vmatpush3.bf16.msra.mxu0 %v1752_v2  ;;  %1670 = vmatpush3.bf16.msra.mxu1 %v1752_v2  ;;  %s2137_s24 = scalar_lea.hbm %s2338_s7, %s2345_s13 }
  0x20   : > { %s1313_s19 = sshll.u32 %s2031_s28, 3  ;;  %1598 = vmatprep.subr.bf16.mxu0 %v1753_v3  ;;  %1667 = vmatprep.subr.bf16.mxu1 %v1753_v3  ;;  %s1890_s12 = smov [#allocation2]  }
  0x21   : > { %s2040_s14 = scalar_lea.vmem %s2331_s0, %s1313_s19  ;;  %s2115_s19 = sand.u32 1, %s1864_s10  }
  0x22   : > { %v400_v4 = vld [vmem:[%s2040_s14] sm:$0xff]  ;;  %v401_v5 = vld [vmem:[%s2040_s14 + $0x8] sm:$0xff]  ;;  %v402_v9 = vld [vmem:[%s2040_s14 + $0x10] sm:$0xff]  ;;  %s2346_s29 = sshll.u32 %s2115_s19, 6  ;;  %s1099_s21 = scalar_lea.sflag [#allocation3], %s2115_s19 }
  0x23   : > { %v408_v6 = vld [vmem:[%s2040_s14 + $0x40] sm:$0xff]  ;;  %v416_v7 = vpack.c.bf16 %v401_v5, %v400_v4  ;;  %v409_v8 = vld [vmem:[%s2040_s14 + $0x48] sm:$0xff]  ;;  %v403_v11 = vld [vmem:[%s2040_s14 + $0x18] sm:$0xff]  ;;  %1599 = vmatpush3.bf16.msra.mxu0 %v1753_v3  ;;  %1671 = vmatpush3.bf16.msra.mxu1 %v1753_v3  ;;  %s2121_s15 = scalar_lea.vmem [#allocation2], %s2346_s29 }
  0x24   : > { %v2047_v10 = vpack.c.bf16 %v409_v8, %v408_v6  ;;  %v410_v12 = vld [vmem:[%s2040_s14 + $0x50] sm:$0xff]  ;;  %v411_v13 = vld [vmem:[%s2040_s14 + $0x58] sm:$0xff]  ;;  %v404_v16 = vld [vmem:[%s2040_s14 + $0x20] sm:$0xff]  ;;  %v417_v18 = vpack.c.bf16 %v403_v11, %v402_v9  ;;  %1616 = vmatprep.subr.bf16.mxu1 %v1754_v14  ;;  %1640 = vmatprep.subr.bf16.mxu0 %v1755_v15 }
  0x25   : > { %1600 = vmatprep.mubr.msk.bf16.mxu0 %vm463_vm0, %v416_v7  ;;  %v405_v17 = vld [vmem:[%s2040_s14 + $0x28] sm:$0xff]  ;;  %v421_v19 = vpack.c.bf16 %v411_v13, %v410_v12  ;;  %v412_v20 = vld [vmem:[%s2040_s14 + $0x60] sm:$0xff]  ;;  %v406_v26 = vld [vmem:[%s2040_s14 + $0x30] sm:$0xff] }
  0x26   : > { %1608 = vmatprep.mubr.msk.bf16.mxu1 %vm463_vm0, %v2047_v10  ;;  %v413_v21 = vld [vmem:[%s2040_s14 + $0x68] sm:$0xff]  ;;  %v418_v24 = vpack.c.bf16 %v405_v17, %v404_v16  ;;  %1601 = vmatmul.mubr.msk.bf16.vlgmr.msra.gmra.mrb[0].mxu0 %vm463_vm0, %v417_v18  ;;  %v407_v27 = vld [vmem:[%s2040_s14 + $0x38] sm:$0xff]  ;;  %v414_v28 = vld [vmem:[%s2040_s14 + $0x70] sm:$0xff] }
  0x27   : > { %v422_v25 = vpack.c.bf16 %v413_v21, %v412_v20  ;;  %1609 = vmatmul.mubr.msk.bf16.vlgmr.msra.gmra.mrb[0].mxu1 %vm463_vm0, %v421_v19  ;;  %1641 = vmatpush3.bf16.msra.mxu0 %v1755_v15  ;;  %v415_v29 = vld [vmem:[%s2040_s14 + $0x78] sm:$0xff]  ;;  %v419_v32 = vpack.c.bf16 %v407_v27, %v406_v26  ;;  %s1128_s14 = sshll.u32 %s2121_s15, 4  ;;  %v2144_v13 = vld [vmem:[%s2337_s6] ss:$0 sm:$0xff]  ;;  %s2139_s14 = int_to_ptr.vmem [resolvable:$true] %s1128_s14 }
  0x28   : > { %1617 = vmatpush3.bf16.msra.mxu1 %v1754_v14  ;;  %1642 = vmatprep.subr.bf16.mxu0 %v1757_v23  ;;  %v423_v33 = vpack.c.bf16 %v415_v29, %v414_v28  ;;  %v2154_v15 = vld [vmem:[%s2335_s4] ss:$0 sm:$0xff]  ;;  %s1762_s25 = scalar_lea.vmem %s2139_s14, 1024 }
  0x29   : > { %1618 = vmatprep.subr.bf16.mxu1 %v1756_v22  ;;  %1604 = vmatprep.mubr.msk.bf16.mxu0 %vm463_vm0, %v418_v24  ;;  %p1763_p0 = scmp.ne.s32.totalorder %s2139_s14, %s1762_s25 }
  0x2a   : > { %1612 = vmatprep.mubr.msk.bf16.mxu1 %vm463_vm0, %v422_v25 }
  0x2b   : > { %1643 = vmatpush3.bf16.msra.mxu0 %v1757_v23  ;;  %p1764_p1 = pnand %p1763_p0, %p1995_p3 }
  0x2c   : > { %1619 = vmatpush3.bf16.msra.mxu1 %v1756_v22  ;;  %1644 = vmatprep.subr.bf16.mxu0 %v1759_v31 }
  0x2d   : > { %1620 = vmatprep.subr.bf16.mxu1 %v1758_v30  ;;  %p1765_p2 = pneg %p1764_p1 }
  0x2e   : > { %1605 = vmatmul.mubr.msk.bf16.gmra.mrb[4].mxu0 %vm463_vm0, %v419_v32 }
  0x2f   : > { %1613 = vmatmul.mubr.msk.bf16.gmra.mrb[4].mxu1 %vm463_vm0, %v423_v33  ;;  %1645 = vmatpush3.bf16.msra.mxu0 %v1759_v31 }
  0x30   : > { %1621 = vmatpush3.bf16.msra.mxu1 %v1758_v30  ;;  %1646 = vmatprep.subr.bf16.mxu0 %v1761_v35 }
  0x31   : > { %1622 = vmatprep.subr.bf16.mxu1 %v1760_v34  ;;  %1624 = vmatprep.mubr.msk.bf16.mxu1 %vm463_vm0, %v416_v7 }
  0x32   : > { %1648 = vmatprep.mubr.msk.bf16.mxu0 %vm463_vm0, %v416_v7 }
  0x33   : > { %1647 = vmatpush3.bf16.msra.mxu0 %v1761_v35 }
  0x34   : > { %1623 = vmatpush3.bf16.msra.mxu1 %v1760_v34 }
  0x36   : > { %1649 = vmatmul.mubr.msk.bf16.vlgmr.msra.gmra.mrb[8].mxu0 %vm463_vm0, %v417_v18 }
  0x37   : > { %1625 = vmatmul.mubr.msk.bf16.vlgmr.msra.gmra.mrb[8].mxu1 %vm463_vm0, %v417_v18  ;;  %1652 = vmatprep.mubr.msk.bf16.mxu0 %vm463_vm0, %v418_v24 }
  0x38   : > { %1628 = vmatprep.mubr.msk.bf16.mxu1 %vm463_vm0, %v418_v24 }
  0x3e   : > { %1653 = vmatmul.mubr.msk.bf16.gmra.mrb[12].mxu0 %vm463_vm0, %v419_v32 }
  0x3f   : > { %1629 = vmatmul.mubr.msk.bf16.gmra.mrb[12].mxu1 %vm463_vm0, %v419_v32  ;;  %1656 = vmatprep.mubr.msk.bf16.mxu0 %vm463_vm0, %v2047_v10 }
  0x40   : > { %1632 = vmatprep.mubr.msk.bf16.mxu1 %vm463_vm0, %v2047_v10 }
  0x46   : > { %1657 = vmatmul.mubr.msk.bf16.gmra.mrb[16].mxu0 %vm463_vm0, %v421_v19 }
  0x47   : > { %1633 = vmatmul.mubr.msk.bf16.gmra.mrb[16].mxu1 %vm463_vm0, %v421_v19  ;;  %1660 = vmatprep.mubr.msk.bf16.mxu0 %vm463_vm0, %v422_v25 }
  0x48   : > { %1636 = vmatprep.mubr.msk.bf16.mxu1 %vm463_vm0, %v422_v25 }
  0x4e   : > { %1661 = vmatmul.mubr.msk.bf16.gmra.mrb[20].mxu0 %vm463_vm0, %v423_v33 }
  0x4f   : > { %1637 = vmatmul.mubr.msk.bf16.gmra.mrb[20].mxu1 %vm463_vm0, %v423_v33 }
  0xf9   : > { %v1602_v37 = vpop.f32.mrb[0].mxu0 }
  0xfa   : > { %v1610_v38 = vpop.f32.mrb[0].mxu1  ;;  %v531_v39 = vadd.f32 %v1602_v37, %v1317_v36  ;;  %v522_v40 = vpop.f32.mrb[1].mxu0 }
  0xfb   : > { %v554_v41 = vpop.f32.mrb[1].mxu1  ;;  %v1603_v42 = vpop.f32.mrb[2].mxu0  ;;  %v563_v44 = vadd.f32 %v1610_v38, %v1317_v36  ;;  %v523_v49 = vadd.f32 %v1317_v36, %v522_v40 }
  0xfc   : > { %v1611_v43 = vpop.f32.mrb[2].mxu1  ;;  %v534_v45 = vadd.f32 %v1603_v42, %v1317_v36  ;;  %v525_v47 = vpop.f32.mrb[3].mxu0  ;;  %v555_v50 = vadd.f32 %v1317_v36, %v554_v41 }
  0xfd   : > { %v566_v46 = vadd.f32 %v1611_v43, %v1317_v36  ;;  %v557_v48 = vpop.f32.mrb[3].mxu1  ;;  %v526_v51 = vadd.f32 %v1317_v36, %v525_v47 }
  0xfe   : > { %v558_v52 = vadd.f32 %v1317_v36, %v557_v48  ;;  %v1470_v53 = vpack.c.bf16 %v534_v45, %v531_v39 }
  0xff   : > { %v1490_v54 = vpack.c.bf16 %v566_v46, %v563_v44  ;;  %v1465_v55 = vpack.c.bf16 %v526_v51, %v523_v49 }
 0x100   : > { %v1485_v56 = vpack.c.bf16 %v558_v52, %v555_v50  ;;  %1542 = vst [vmem:[%s2121_s15 + $0x8] sm:$0xff] %v1470_v53  }
 0x101   : > { %1546 = vst [vmem:[%s2121_s15 + $0x28] sm:$0xff] %v1490_v54   ;;  %1466 = vst [vmem:[%s2121_s15] sm:$0xff] %v1465_v55   ;;  %v1606_v57 = vpop.f32.mrb[4].mxu0 }
 0x102   : > { %1545 = vst [vmem:[%s2121_s15 + $0x20] sm:$0xff] %v1485_v56   ;;  %v1614_v58 = vpop.f32.mrb[4].mxu1  ;;  %v547_v59 = vadd.f32 %v1606_v57, %v1317_v36  ;;  %v538_v60 = vpop.f32.mrb[5].mxu0 }
 0x103   : > { %v570_v61 = vpop.f32.mrb[5].mxu1  ;;  %v1607_v62 = vpop.f32.mrb[6].mxu0  ;;  %v579_v0 = vadd.f32 %v1614_v58, %v1317_v36  ;;  %v539_v5 = vadd.f32 %v1317_v36, %v538_v60 }
 0x104   : > { %v1615_v63 = vpop.f32.mrb[6].mxu1  ;;  %v550_v1 = vadd.f32 %v1607_v62, %v1317_v36  ;;  %v541_v3 = vpop.f32.mrb[7].mxu0  ;;  %v571_v6 = vadd.f32 %v1317_v36, %v570_v61 }
 0x105   : > { %v582_v2 = vadd.f32 %v1615_v63, %v1317_v36  ;;  %v573_v4 = vpop.f32.mrb[7].mxu1  ;;  %v542_v7 = vadd.f32 %v1317_v36, %v541_v3 }
 0x106   : > { %v574_v8 = vadd.f32 %v1317_v36, %v573_v4  ;;  %v1480_v9 = vpack.c.bf16 %v550_v1, %v547_v59 }
 0x107   : > { %v1500_v10 = vpack.c.bf16 %v582_v2, %v579_v0  ;;  %v1475_v11 = vpack.c.bf16 %v542_v7, %v539_v5 }
 0x108   : > { %v1495_v12 = vpack.c.bf16 %v574_v8, %v571_v6  ;;  %1544 = vst [vmem:[%s2121_s15 + $0x18] sm:$0xff] %v1480_v9  }
 0x109   : > { %1548 = vst [vmem:[%s2121_s15 + $0x38] sm:$0xff] %v1500_v10   ;;  %1543 = vst [vmem:[%s2121_s15 + $0x10] sm:$0xff] %v1475_v11   ;;  %v1650_v16 = vpop.f32.mrb[8].mxu0 }
 0x10a   : > { %1547 = vst [vmem:[%s2121_s15 + $0x30] sm:$0xff] %v1495_v12   ;;  %v1626_v14 = vpop.f32.mrb[8].mxu1  ;;  %v803_v17 = vadd.f32 %v1650_v16, %v2144_v13  ;;  %v794_v19 = vpop.f32.mrb[9].mxu0  ;;  %s1766_s15 = sshll.u32 %s1890_s12, 4  ;;  %s1767_s15 = int_to_ptr.vmem [resolvable:$false] %s1766_s15 }
 0x10b   : > { %v658_v18 = vpop.f32.mrb[9].mxu1  ;;  %s1768_s13 = scalar_lea.vmem %s1767_s15, 2048  ;;  %p1769_p4 = scmp.lt.s32.totalorder %s2139_s14, %s1767_s15 }
 0x10c   : > { %p1770_p5 = scmp.lt.s32.totalorder %s1768_s13, %s1762_s25 }
 0x10e   : > { %p1771_p6 = por %p1770_p5, %p1769_p4 }
 0x110   : > { %p1772_p7 = pnand %p1771_p6, %p1765_p2 }
 0x112   : > { %1775 = shalt.err (!%p1772_p7)
}
 0x113   : > { %s1776_s18 = scalar_lea.hbm %s2137_s24, 1024  ;;  %s1780_s12 = scalar_lea.hbm %s2338_s7, 4096 }
 0x114   : > { %p1777_p9 = scmp.ne.s32.totalorder %s2137_s24, %s1776_s18  ;;  %p1781_p12 = scmp.lt.u32.totalorder %s2137_s24, %s2338_s7 }
 0x115   : > { %p1782_p13 = scmp.lt.u32.totalorder %s1780_s12, %s1776_s18  ;;  %p1784_p1 = scmp.lt.u32.totalorder %s1776_s18, %s2137_s24 }
 0x116   : > { %p1778_p10 = pnand %p1777_p9, %p1995_p3 }
 0x117   : > { %p1783_p0 = por %p1782_p13, %p1781_p12 }
 0x118   : > { %p1779_p11 = pneg %p1778_p10 }
 0x119   : > { %p1785_p2 = por %p1784_p1, %p1783_p0 }
 0x11b   : > { %p1786_p4 = pnand %p1785_p2, %p1779_p11 }
 0x11d   : > { %1789 = shalt.err (!%p1786_p4)
}
 0x11e   : > { %s1891_s13 = smov 64   ;;  %s1892_s25 = smov 4   ;;  %vm1081_vm1 = vcmask 519168   ;;  %v795_v20 = vadd.f32 %v2144_v13, %v794_v19  ;;  %v1627_v21 = vpop.f32.mrb[10].mxu1  ;;  %v1651_v22 = vpop.f32.mrb[10].mxu0  ;;  %v667_v23 = vadd.f32 %v1626_v14, %v2154_v15  ;;  %v1448_v24 = vpack.c.bf16 %v803_v17, %v803_v17 }
 0x11f   : > { %1672 = dma.vmem_to_hbm [thread:$0]  (%p1995_p3), %s2139_s14, 1024, %s2137_s24, %s1099_s21, %s1891_s13, %s1891_s13, %s1892_s25   ;;  %v670_v25 = vadd.f32 %v1627_v21, %v2154_v15  ;;  %v806_v26 = vadd.f32 %v1651_v22, %v2144_v13  ;;  %v661_v27 = vpop.f32.mrb[11].mxu1  ;;  %v797_v28 = vpop.f32.mrb[11].mxu0  ;;  %v659_v29 = vadd.f32 %v2154_v15, %v658_v18 }
 0x120   : > { %s2353_s29 = sshll.u32 %s2031_s28, 2  ;;  %v1446_v30 = vpack.c.bf16 %v795_v20, %v795_v20  ;;  %v662_v31 = vadd.f32 %v2154_v15, %v661_v27  ;;  %v798_v32 = vadd.f32 %v2144_v13, %v797_v28  ;;  %s2354_s28 = sshll.u32 %s2115_s19, 6  ;;  %v1630_v37 = vpop.f32.mrb[12].mxu1  ;;  %v1654_v38 = vpop.f32.mrb[12].mxu0 }
 0x121   : > { %s2189_s18 = scalar_lea.vmem %s2340_s9, %s2353_s29  ;;  %v1510_v33 = vpack.c.bf16 %v670_v25, %v667_v23  ;;  %v1449_v34 = vpack.c.bf16 %v806_v26, %v806_v26  ;;  %s2204_s14 = scalar_lea.vmem [#allocation4], %s2354_s28  ;;  %v819_v39 = vadd.f32 %v1654_v38, %v2144_v13  ;;  %v674_v40 = vpop.f32.mrb[13].mxu1  ;;  %v810_v41 = vpop.f32.mrb[13].mxu0  ;;  %v683_v45 = vadd.f32 %v1630_v37, %v2154_v15 }
 0x122   : > { %1084 = vst.msk [vmem:[%s2189_s18 + $0x8] sm:$0xf] %vm1081_vm1, %v1448_v24  ;;  %1082 = vst.msk [vmem:[%s2189_s18] sm:$0xf] %vm1081_vm1, %v1446_v30  ;;  %v1505_v35 = vpack.c.bf16 %v662_v31, %v659_v29  ;;  %v1447_v36 = vpack.c.bf16 %v798_v32, %v798_v32  ;;  %v811_v42 = vadd.f32 %v2144_v13, %v810_v41  ;;  %v1631_v43 = vpop.f32.mrb[14].mxu1  ;;  %v1655_v44 = vpop.f32.mrb[14].mxu0 }
 0x123   : > { %1549 = vst [vmem:[%s2204_s14 + $0x8] sm:$0xff] %v1510_v33   ;;  %1085 = vst.msk [vmem:[%s2189_s18 + $0xc] sm:$0xf] %vm1081_vm1, %v1449_v34  ;;  %v1452_v46 = vpack.c.bf16 %v819_v39, %v819_v39  ;;  %v686_v47 = vadd.f32 %v1631_v43, %v2154_v15  ;;  %v822_v48 = vadd.f32 %v1655_v44, %v2144_v13  ;;  %v677_v49 = vpop.f32.mrb[15].mxu1  ;;  %v813_v50 = vpop.f32.mrb[15].mxu0  ;;  %s1146_s24 = sshll.u32 %s2204_s14, 4  ;;  %s2268_s24 = int_to_ptr.vmem [resolvable:$true] %s1146_s24 }
 0x124   : > { %1506 = vst [vmem:[%s2204_s14] sm:$0xff] %v1505_v35   ;;  %1083 = vst.msk [vmem:[%s2189_s18 + $0x4] sm:$0xf] %vm1081_vm1, %v1447_v36  ;;  %v675_v51 = vadd.f32 %v2154_v15, %v674_v40  ;;  %v1450_v52 = vpack.c.bf16 %v811_v42, %v811_v42  ;;  %v678_v53 = vadd.f32 %v2154_v15, %v677_v49  ;;  %v1634_v59 = vpop.f32.mrb[16].mxu1  ;;  %v1658_v60 = vpop.f32.mrb[16].mxu0  ;;  %s2355_s21 = sshll.u32 %s2126_s20, 6  ;;  %s1104_s26 = scalar_lea.sflag [#allocation5], %s2115_s19 }
 0x125   : > { %v814_v54 = vadd.f32 %v2144_v13, %v813_v50  ;;  %1088 = vst.msk [vmem:[%s2189_s18 + $0x18] sm:$0xf] %vm1081_vm1, %v1452_v46  ;;  %v1520_v55 = vpack.c.bf16 %v686_v47, %v683_v45  ;;  %v1453_v56 = vpack.c.bf16 %v822_v48, %v822_v48  ;;  %v835_v61 = vadd.f32 %v1658_v60, %v2144_v13  ;;  %v690_v62 = vpop.f32.mrb[17].mxu1  ;;  %v826_v63 = vpop.f32.mrb[17].mxu0  ;;  %s2266_s29 = scalar_lea.hbm %s2339_s8, %s2355_s21  ;;  %s1790_s17 = scalar_lea.vmem %s2268_s24, 1024 }
 0x126   : > { %1086 = vst.msk [vmem:[%s2189_s18 + $0x10] sm:$0xf] %vm1081_vm1, %v1450_v52  ;;  %v1515_v57 = vpack.c.bf16 %v678_v53, %v675_v51  ;;  %v827_v0 = vadd.f32 %v2144_v13, %v826_v63  ;;  %v1635_v1 = vpop.f32.mrb[18].mxu1  ;;  %v1659_v2 = vpop.f32.mrb[18].mxu0  ;;  %v699_v3 = vadd.f32 %v1634_v59, %v2154_v15  ;;  %v691_v9 = vadd.f32 %v2154_v15, %v690_v62  ;;  %p1791_p5 = scmp.ne.s32.totalorder %s2268_s24, %s1790_s17  ;;  %s1893_s20 = smov [#allocation4]  }
 0x127   : > { %v1451_v58 = vpack.c.bf16 %v814_v54, %v814_v54  ;;  %1551 = vst [vmem:[%s2204_s14 + $0x18] sm:$0xff] %v1520_v55   ;;  %1089 = vst.msk [vmem:[%s2189_s18 + $0x1c] sm:$0xf] %vm1081_vm1, %v1453_v56  ;;  %v1456_v4 = vpack.c.bf16 %v835_v61, %v835_v61  ;;  %v702_v5 = vadd.f32 %v1635_v1, %v2154_v15  ;;  %v693_v7 = vpop.f32.mrb[19].mxu1  ;;  %v829_v8 = vpop.f32.mrb[19].mxu0  ;;  %s1794_s28 = sshll.u32 %s1893_s20, 4  ;;  %s1795_s28 = int_to_ptr.vmem [resolvable:$false] %s1794_s28 }
 0x128   : > { %1550 = vst [vmem:[%s2204_s14 + $0x10] sm:$0xff] %v1515_v57   ;;  %v838_v6 = vadd.f32 %v1659_v2, %v2144_v13  ;;  %v1454_v10 = vpack.c.bf16 %v827_v0, %v827_v0  ;;  %v694_v11 = vadd.f32 %v2154_v15, %v693_v7  ;;  %v830_v12 = vadd.f32 %v2144_v13, %v829_v8  ;;  %v1638_v19 = vpop.f32.mrb[20].mxu1  ;;  %v1662_v20 = vpop.f32.mrb[20].mxu0  ;;  %p1792_p6 = pnand %p1791_p5, %p1995_p3  ;;  %s1796_s21 = scalar_lea.vmem %s1795_s28, 2048 }
 0x129   : > { %1087 = vst.msk [vmem:[%s2189_s18 + $0x14] sm:$0xf] %vm1081_vm1, %v1451_v58  ;;  %1092 = vst.msk [vmem:[%s2189_s18 + $0x28] sm:$0xf] %vm1081_vm1, %v1456_v4  ;;  %v1530_v14 = vpack.c.bf16 %v702_v5, %v699_v3  ;;  %v851_v21 = vadd.f32 %v1662_v20, %v2144_v13  ;;  %v706_v22 = vpop.f32.mrb[21].mxu1  ;;  %v842_v23 = vpop.f32.mrb[21].mxu0  ;;  %v715_v27 = vadd.f32 %v1638_v19, %v2154_v15  ;;  %p1797_p9 = scmp.lt.s32.totalorder %s2268_s24, %s1795_s28  ;;  %p1798_p10 = scmp.lt.s32.totalorder %s1796_s21, %s1790_s17 }
 0x12a   : > { %v1457_v16 = vpack.c.bf16 %v838_v6, %v838_v6  ;;  %1090 = vst.msk [vmem:[%s2189_s18 + $0x20] sm:$0xf] %vm1081_vm1, %v1454_v10  ;;  %v1525_v17 = vpack.c.bf16 %v694_v11, %v691_v9  ;;  %v1455_v18 = vpack.c.bf16 %v830_v12, %v830_v12  ;;  %v843_v24 = vadd.f32 %v2144_v13, %v842_v23  ;;  %v1639_v25 = vpop.f32.mrb[22].mxu1  ;;  %v1663_v26 = vpop.f32.mrb[22].mxu0  ;;  %p1793_p7 = pneg %p1792_p6 }
 0x12b   : > { %1553 = vst [vmem:[%s2204_s14 + $0x28] sm:$0xff] %v1530_v14   ;;  %v1460_v28 = vpack.c.bf16 %v851_v21, %v851_v21  ;;  %v718_v29 = vadd.f32 %v1639_v25, %v2154_v15  ;;  %v854_v30 = vadd.f32 %v1663_v26, %v2144_v13  ;;  %v709_v31 = vpop.f32.mrb[23].mxu1  ;;  %v845_v32 = vpop.f32.mrb[23].mxu0  ;;  %v707_v33 = vadd.f32 %v2154_v15, %v706_v22  ;;  %p1799_p11 = por %p1798_p10, %p1797_p9 }
 0x12c   : > { %1093 = vst.msk [vmem:[%s2189_s18 + $0x2c] sm:$0xf] %vm1081_vm1, %v1457_v16  ;;  %1552 = vst [vmem:[%s2204_s14 + $0x20] sm:$0xff] %v1525_v17   ;;  %v1458_v34 = vpack.c.bf16 %v843_v24, %v843_v24  ;;  %v710_v35 = vadd.f32 %v2154_v15, %v709_v31  ;;  %v846_v36 = vadd.f32 %v2144_v13, %v845_v32 }
 0x12d   : > { %1091 = vst.msk [vmem:[%s2189_s18 + $0x24] sm:$0xf] %vm1081_vm1, %v1455_v18  ;;  %1096 = vst.msk [vmem:[%s2189_s18 + $0x38] sm:$0xf] %vm1081_vm1, %v1460_v28  ;;  %v1540_v37 = vpack.c.bf16 %v718_v29, %v715_v27  ;;  %v1461_v38 = vpack.c.bf16 %v854_v30, %v854_v30  ;;  %p1800_p12 = pnand %p1799_p11, %p1793_p7 }
 0x12e   : > { %1094 = vst.msk [vmem:[%s2189_s18 + $0x30] sm:$0xf] %vm1081_vm1, %v1458_v34  ;;  %v1535_v39 = vpack.c.bf16 %v710_v35, %v707_v33  ;;  %v1459_v40 = vpack.c.bf16 %v846_v36, %v846_v36 }
 0x12f   : > { %1555 = vst [vmem:[%s2204_s14 + $0x38] sm:$0xff] %v1540_v37   ;;  %1097 = vst.msk [vmem:[%s2189_s18 + $0x3c] sm:$0xf] %vm1081_vm1, %v1461_v38 }
 0x130   : > { %1554 = vst [vmem:[%s2204_s14 + $0x30] sm:$0xff] %v1535_v39   ;;  %1095 = vst.msk [vmem:[%s2189_s18 + $0x34] sm:$0xf] %vm1081_vm1, %v1459_v40 }
 0x131   : > { %1803 = shalt.err (!%p1800_p12)
}
 0x132   : > { %s1804_s18 = scalar_lea.hbm %s2266_s29, 1024  ;;  %s1808_s15 = scalar_lea.hbm %s2339_s8, 4096 }
 0x133   : > { %p1805_p13 = scmp.ne.s32.totalorder %s2266_s29, %s1804_s18  ;;  %p1809_p2 = scmp.lt.u32.totalorder %s2266_s29, %s2339_s8 }
 0x134   : > { %p1810_p4 = scmp.lt.u32.totalorder %s1808_s15, %s1804_s18  ;;  %p1812_p6 = scmp.lt.u32.totalorder %s1804_s18, %s2266_s29 }
 0x135   : > { %p1806_p0 = pnand %p1805_p13, %p1995_p3 }
 0x136   : > { %p1811_p5 = por %p1810_p4, %p1809_p2 }
 0x137   : > { %p1807_p1 = pneg %p1806_p0 }
 0x138   : > { %p1813_p7 = por %p1812_p6, %p1811_p5 }
 0x13a   : > { %p1814_p9 = pnand %p1813_p7, %p1807_p1 }
 0x13c   : > { %1817 = shalt.err (!%p1814_p9)
}
 0x13d   : > { %1673 = dma.vmem_to_hbm [thread:$0]  (%p1995_p3), %s2268_s24, 1024, %s2266_s29, %s1104_s26, %s1891_s13, %s1891_s13, %s1892_s25  }
 0x13e PF: > { %p1683_p10 = scmp.ge.s32.totalorder %s1888_s16, 2  ;;  %s1165_s17 = sand.u32 1, %s1860_s30  }
 0x13f   : > { %s1166_s21 = scalar_lea.sflag [#allocation3], %s1165_s17 }
 0x140   : > { %p1677_p11 = pnand %p1683_p10, %p2004_p8 }
 0x142   : > { %1851 = dma.done.wait (!%p1677_p11), %s1166_s21, 1024  }
 0x143   : > { %1853 = vsyncadd (!%p1677_p11), %s1166_s21, 4294966272  ;;  %s1175_s22 = scalar_lea.sflag [#allocation5], %s1165_s17 }
 0x144   : > { %1855 = dma.done.wait (!%p1677_p11), %s1175_s22, 1024  }
 0x145   : > { %1857 = vsyncadd (!%p1677_p11), %s1175_s22, 4294966272  ;;  %s26_s16 = sadd.s32 1, %s1888_s16   ;;  %s2356_s12 = sld [smem:[#allocation8_spill]] }
 0x146   : > { %p23_p12 = scmp.ge.s32.totalorder %s26_s16, 6   ;;  %s2357_s13 = sld [smem:[#allocation9_spill]] }
 0x147   : > { %s2358_s14 = sld [smem:[#allocation10_spill]]  ;;  %s2359_s15 = sld [smem:[#allocation11_spill]] }
 0x148   : > { %s2360_s30 = smov %s1864_s10  ;;  %s2361_s10 = smov %s1868_s11 }
 0x149   : > { %s2362_s11 = smov %s2013_s27  ;;  %25 = sbr.rel (!%p23_p12) target bundleno = 7 (0x7), region = 112 }
 0x150   :  { %1192 = vsyncpa [#allocation3], 1 }
 0x151   :  { %1194 = vsyncpa [#allocation3 + $0x1], 1 }
 0x152   :  { %1195 = vsyncpa [#allocation5], 1 }
 0x153   :  { %1197 = vsyncpa [#allocation5 + $0x1], 1 }

</bundles_post_ra>
